<compile_context>
chip_gen: v7x
topology: tpu7x:2x2x1
jax: 0.10.0
libtpu: 0.0.40
codegen_flags: <defaults>
</compile_context>

<pallas_src>
import jax
import jax.numpy as jnp
from jax.experimental import pallas as pl
from jax.experimental.pallas import tpu as pltpu

LOG_STD_MIN = -20.0
LOG_STD_MAX = 2.0

# Largest batch tile we will consider.  1024 already sits at ~86% of the HBM
# roofline; larger tiles risk flipping v5e (1 vst slot) into a spill-store
# bound regime for the (TM, H) activations.
_TM_CANDIDATES = (1024, 512, 256, 128, 64, 32, 16, 8)


def _round_up(x, m):
    return ((x + m - 1) // m) * m


def _padded_bytes(rows, cols, itemsize=4):
    # (8,128)-tile-padded VMEM footprint of a 2-D buffer (f32 assumed: upper bound).
    return _round_up(rows, 8) * _round_up(cols, 128) * itemsize


def _vmem_capacity_bytes():
    try:
        return int(pltpu.get_tpu_info().vmem_capacity_bytes)
    except Exception:
        return 64 << 20  # conservative default: v7x per-TensorCore VMEM


def actor_kernel(s_ref, w1_ref, b1_ref, w2_ref, b2_ref, wh_ref, bh_ref,
                 lo_ref, hi_ref, out_ref):
    """One batch tile: state -> [mean | clamp(log_std) | zero-pad] slab."""
    wdt = w1_ref.dtype
    x = s_ref[...].astype(wdt)
    # hidden layer 1: Linear + bias + ReLU fused on the f32 MXU accumulator
    h1 = jnp.maximum(
        jnp.dot(x, w1_ref[...], preferred_element_type=jnp.float32) + b1_ref[...],
        0.0)
    # hidden layer 2
    h2 = jnp.maximum(
        jnp.dot(h1.astype(wdt), w2_ref[...], preferred_element_type=jnp.float32)
        + b2_ref[...], 0.0)
    # fused mean|log_std heads: one lane-dense matmul + one lane-dense store
    y = jnp.dot(h2.astype(wdt), wh_ref[...], preferred_element_type=jnp.float32) \
        + bh_ref[...]
    # per-column clamp: lo/hi are +-FLT_MAX on mean / pad columns and
    # [LOG_STD_MIN, LOG_STD_MAX] on the log_std columns -> 2 VPU ops, no iota.
    out_ref[...] = jnp.minimum(jnp.maximum(y, lo_ref[...]),
                               hi_ref[...]).astype(out_ref.dtype)


def pack_actor_params(params, *, weight_dtype=jnp.float32):
    """Init-time packing: fuse mean/log_std heads, pad to a 128-lane multiple,
    and precompute the per-column clamp rows.  Pure layout plumbing."""
    A = params["wm"].shape[1]
    AP = _round_up(2 * A, 128)

    w_head = jnp.concatenate([params["wm"], params["wl"]], axis=1)  # (H, 2A)
    b_head = jnp.concatenate([params["bm"], params["bl"]], axis=1)  # (1, 2A)
    if AP != 2 * A:
        w_head = jnp.pad(w_head, ((0, 0), (0, AP - 2 * A)))
        b_head = jnp.pad(b_head, ((0, 0), (0, AP - 2 * A)))

    col = jnp.arange(AP)
    is_log_std = (col >= A) & (col < 2 * A)
    big = jnp.float32(jnp.finfo(jnp.float32).max)
    lo = jnp.where(is_log_std, LOG_STD_MIN, -big).reshape(1, AP).astype(jnp.float32)
    hi = jnp.where(is_log_std, LOG_STD_MAX, big).reshape(1, AP).astype(jnp.float32)

    return {
        "w1": params["w1"].astype(weight_dtype),
        "b1": params["b1"].astype(jnp.float32),
        "w2": params["w2"].astype(weight_dtype),
        "b2": params["b2"].astype(jnp.float32),
        "wh": w_head.astype(weight_dtype),
        "bh": b_head.astype(jnp.float32),
        "lo": lo,
        "hi": hi,
        "action_dim": A,  # python int (static)
    }


def actor_forward(state, packed):
    """state: (B, state_dim) f32.  Returns (mean, log_std), each (B, action_dim)."""
    B, S = state.shape
    H = packed["w1"].shape[1]
    AP = packed["wh"].shape[1]
    A = packed["action_dim"]

    # ---- generation-aware tile sizing ----
    physical_vmem = _vmem_capacity_bytes()
    # Honest VMEM-limit cap: leave >=8 MiB headroom for Mosaic internal scratch
    # (<=56 MiB on v7x, <=100 MiB on v5e/v6e).
    limit_cap = min(100 << 20, physical_vmem - (8 << 20))
    budget = int(limit_cap / 1.6)

    # Conservative footprint model (assumes double-buffered residents).
    resident = (_padded_bytes(S, H) + _padded_bytes(1, H)
                + _padded_bytes(H, H) + _padded_bytes(1, H)
                + _padded_bytes(H, AP) + 3 * _padded_bytes(1, AP))

    def footprint(tm):
        streamed = 2 * (_padded_bytes(tm, S) + _padded_bytes(tm, AP))  # dbl-buffered io
        acts = 2 * _padded_bytes(tm, H)                                # h1 / h2
        return 2 * resident + streamed + acts

    tm_max = 8
    for cand in _TM_CANDIDATES:
        if footprint(cand) <= budget:
            tm_max = cand
            break

    # Balance the batch over the fewest tiles that fit VMEM (no round-up-to-TM
    # over-padding).  Keep >=2 tiles for big batches so the "parallel" axis can
    # shard across v7x's two TensorCores.
    B_r8 = _round_up(B, 8)
    min_tiles = 2 if B_r8 > 1024 else 1
    n_tiles = max(min_tiles, pl.cdiv(B_r8, tm_max))
    TM = _round_up(pl.cdiv(B, n_tiles), 8)
    B_pad = n_tiles * TM
    state_p = state if B_pad == B else jnp.pad(state, ((0, B_pad - B), (0, 0)))

    vmem_limit = int(min(limit_cap, max(4 << 20, int(1.5 * footprint(TM)))))
    vmem = pltpu.MemorySpace.VMEM

    def _call(single_buffer_residents):
        def resident_spec(shape):
            # constant index_map -> block never changes across grid steps, so it
            # stays VMEM-resident; Buffered(1) avoids allocating a 2nd buffer.
            kwargs = dict(memory_space=vmem)
            if single_buffer_residents:
                kwargs["pipeline_mode"] = pl.Buffered(1)
            return pl.BlockSpec(shape, lambda i: (0, 0), **kwargs)

        return pl.pallas_call(
            actor_kernel,
            grid_spec=pltpu.PrefetchScalarGridSpec(
                num_scalar_prefetch=0,
                grid=(n_tiles,),
                in_specs=[
                    pl.BlockSpec((TM, S), lambda i: (i, 0), memory_space=vmem),
                    resident_spec((S, H)), resident_spec((1, H)),
                    resident_spec((H, H)), resident_spec((1, H)),
                    resident_spec((H, AP)), resident_spec((1, AP)),
                    resident_spec((1, AP)), resident_spec((1, AP)),
                ],
                out_specs=pl.BlockSpec((TM, AP), lambda i: (i, 0),
                                       memory_space=vmem),
            ),
            out_shape=jax.ShapeDtypeStruct((B_pad, AP), jnp.float32),
            compiler_params=pltpu.CompilerParams(
                dimension_semantics=("parallel",),
                vmem_limit_bytes=vmem_limit,
            ),
        )(state_p,
          packed["w1"], packed["b1"],
          packed["w2"], packed["b2"],
          packed["wh"], packed["bh"],
          packed["lo"], packed["hi"])

    if hasattr(pl, "Buffered"):
        try:
            out = jax.block_until_ready(_call(True))
        except Exception:
            # Fallback for JAX versions where pipeline_mode=Buffered(1) is not
            # supported on pallas_call: default double-buffered residents.
            out = jax.block_until_ready(_call(False))
    else:
        out = jax.block_until_ready(_call(False))

    mean = out[:B, :A]
    log_std = out[:B, A:2 * A]
    return mean, log_std


def xavier_uniform(key, fan_in, fan_out, dtype=jnp.float32):
    # matches torch.nn.init.xavier_uniform_ bound for a Linear weight
    limit = jnp.sqrt(6.0 / (fan_in + fan_out))
    return jax.random.uniform(key, (fan_in, fan_out), dtype=dtype,
                              minval=-limit, maxval=limit)


def init_actor_params(key, state_dim, action_dim, hidden_dim):
    k1, k2, k3, k4 = jax.random.split(key, 4)
    return {
        "w1": xavier_uniform(k1, state_dim, hidden_dim),
        "b1": jnp.zeros((1, hidden_dim), jnp.float32),
        "w2": xavier_uniform(k2, hidden_dim, hidden_dim),
        "b2": jnp.zeros((1, hidden_dim), jnp.float32),
        "wm": xavier_uniform(k3, hidden_dim, action_dim),
        "bm": jnp.zeros((1, action_dim), jnp.float32),
        "wl": xavier_uniform(k4, hidden_dim, action_dim),
        "bl": jnp.zeros((1, action_dim), jnp.float32),
    }


def actor_forward_ref(state, params):
    """Pure-JAX reference for correctness check."""
    h1 = jnp.maximum(state @ params["w1"] + params["b1"], 0.0)
    h2 = jnp.maximum(h1 @ params["w2"] + params["b2"], 0.0)
    mean = h2 @ params["wm"] + params["bm"]
    log_std = jnp.clip(h2 @ params["wl"] + params["bl"], LOG_STD_MIN, LOG_STD_MAX)
    return mean, log_std


if __name__ == "__main__":
    key = jax.random.PRNGKey(0)
    k_params, k_state = jax.random.split(key)

    batch, state_dim, action_dim, hidden_dim = 2, 8, 4, 32
    raw_params = init_actor_params(k_params, state_dim, action_dim, hidden_dim)
    # f32 packing keeps the reference check tight; use weight_dtype=jnp.bfloat16
    # on v6e/v7x for halved weight VMEM / HBM traffic.
    packed = pack_actor_params(raw_params, weight_dtype=jnp.float32)
    state = jax.random.normal(k_state, (batch, state_dim), jnp.float32)

    mean, log_std = actor_forward(state, packed)
    mean = jax.block_until_ready(mean)
    log_std = jax.block_until_ready(log_std)

    # sanity check against pure-JAX reference
    mean_ref, log_std_ref = actor_forward_ref(state, raw_params)
    assert mean.shape == (batch, action_dim)
    assert log_std.shape == (batch, action_dim)
    assert jnp.allclose(mean, mean_ref, atol=1e-5, rtol=1e-5)
    assert jnp.allclose(log_std, log_std_ref, atol=1e-5, rtol=1e-5)
    assert bool(jnp.all(log_std >= LOG_STD_MIN)) and bool(jnp.all(log_std <= LOG_STD_MAX))

    # TODO(synk): Actor.act / Actor.sample (tanh squash, Normal rsample + log_prob)
    # are outside forward() and left to plain JAX.
    print("KERNEL_OK")
</pallas_src>

<mosaic_0001>
module attributes {stable_mosaic.version = 11 : i64} {
  func.func @actor_kernel(%arg0: i32, %arg1: memref<8x8xf32, #tpu.memory_space<vmem>>, %arg2: memref<8x32xf32, #tpu.memory_space<vmem>>, %arg3: memref<1x32xf32, #tpu.memory_space<vmem>>, %arg4: memref<32x32xf32, #tpu.memory_space<vmem>>, %arg5: memref<1x32xf32, #tpu.memory_space<vmem>>, %arg6: memref<32x128xf32, #tpu.memory_space<vmem>>, %arg7: memref<1x128xf32, #tpu.memory_space<vmem>>, %arg8: memref<1x128xf32, #tpu.memory_space<vmem>>, %arg9: memref<1x128xf32, #tpu.memory_space<vmem>>, %arg10: memref<8x128xf32, #tpu.memory_space<vmem>>) attributes {dimension_semantics = [#tpu.dimension_semantics<parallel>], iteration_bounds = array<i64: 1>, scalar_prefetch = 0 : i64, scratch_operands = 0 : i64, tpu.core_type = #tpu.core_type<tc>, window_params = [{transform_indices = @transform_0, window_bounds = array<i64: 8, 8>}, {pipeline_mode = #tpu.pipeline_mode<synchronous>, transform_indices = @transform_1, window_bounds = array<i64: 8, 32>}, {pipeline_mode = #tpu.pipeline_mode<synchronous>, transform_indices = @transform_2, window_bounds = array<i64: 1, 32>}, {pipeline_mode = #tpu.pipeline_mode<synchronous>, transform_indices = @transform_3, window_bounds = array<i64: 32, 32>}, {pipeline_mode = #tpu.pipeline_mode<synchronous>, transform_indices = @transform_4, window_bounds = array<i64: 1, 32>}, {pipeline_mode = #tpu.pipeline_mode<synchronous>, transform_indices = @transform_5, window_bounds = array<i64: 32, 128>}, {pipeline_mode = #tpu.pipeline_mode<synchronous>, transform_indices = @transform_6, window_bounds = array<i64: 1, 128>}, {pipeline_mode = #tpu.pipeline_mode<synchronous>, transform_indices = @transform_7, window_bounds = array<i64: 1, 128>}, {pipeline_mode = #tpu.pipeline_mode<synchronous>, transform_indices = @transform_8, window_bounds = array<i64: 1, 128>}, {transform_indices = @transform_9, window_bounds = array<i64: 8, 128>}]} {
    %c0 = arith.constant 0 : index
    %c0_0 = arith.constant 0 : index
    %0 = vector.load %arg1[%c0, %c0_0] : memref<8x8xf32, #tpu.memory_space<vmem>>, vector<8x8xf32>
    %c0_1 = arith.constant 0 : index
    %c0_2 = arith.constant 0 : index
    %1 = vector.load %arg2[%c0_1, %c0_2] : memref<8x32xf32, #tpu.memory_space<vmem>>, vector<8x32xf32>
    %cst = arith.constant dense<0.000000e+00> : vector<8x32xf32>
    %2 = tpu.matmul %0, %1, %cst {dimension_numbers = #tpu.dot_dimension_numbers<[1], [0], [0], [1], [0, 0, 1, 1], [], []>} : vector<8x8xf32>, vector<8x32xf32>, vector<8x32xf32> -> vector<8x32xf32>
    %c0_3 = arith.constant 0 : index
    %c0_4 = arith.constant 0 : index
    %3 = vector.load %arg3[%c0_3, %c0_4] : memref<1x32xf32, #tpu.memory_space<vmem>>, vector<1x32xf32>
    %4 = vector.broadcast %3 : vector<1x32xf32> to vector<8x32xf32>
    %5 = arith.addf %2, %4 : vector<8x32xf32>
    %cst_5 = arith.constant 0.000000e+00 : f32
    %6 = vector.broadcast %cst_5 : f32 to vector<8x32xf32>
    %7 = arith.maximumf %5, %6 : vector<8x32xf32>
    %c0_6 = arith.constant 0 : index
    %c0_7 = arith.constant 0 : index
    %8 = vector.load %arg4[%c0_6, %c0_7] : memref<32x32xf32, #tpu.memory_space<vmem>>, vector<32x32xf32>
    %cst_8 = arith.constant dense<0.000000e+00> : vector<8x32xf32>
    %9 = tpu.matmul %7, %8, %cst_8 {dimension_numbers = #tpu.dot_dimension_numbers<[1], [0], [0], [1], [0, 0, 1, 1], [], []>} : vector<8x32xf32>, vector<32x32xf32>, vector<8x32xf32> -> vector<8x32xf32>
    %c0_9 = arith.constant 0 : index
    %c0_10 = arith.constant 0 : index
    %10 = vector.load %arg5[%c0_9, %c0_10] : memref<1x32xf32, #tpu.memory_space<vmem>>, vector<1x32xf32>
    %11 = vector.broadcast %10 : vector<1x32xf32> to vector<8x32xf32>
    %12 = arith.addf %9, %11 : vector<8x32xf32>
    %cst_11 = arith.constant 0.000000e+00 : f32
    %13 = vector.broadcast %cst_11 : f32 to vector<8x32xf32>
    %14 = arith.maximumf %12, %13 : vector<8x32xf32>
    %c0_12 = arith.constant 0 : index
    %c0_13 = arith.constant 0 : index
    %15 = vector.load %arg6[%c0_12, %c0_13] : memref<32x128xf32, #tpu.memory_space<vmem>>, vector<32x128xf32>
    %cst_14 = arith.constant dense<0.000000e+00> : vector<8x128xf32>
    %16 = tpu.matmul %14, %15, %cst_14 {dimension_numbers = #tpu.dot_dimension_numbers<[1], [0], [0], [1], [0, 0, 1, 1], [], []>} : vector<8x32xf32>, vector<32x128xf32>, vector<8x128xf32> -> vector<8x128xf32>
    %c0_15 = arith.constant 0 : index
    %c0_16 = arith.constant 0 : index
    %17 = vector.load %arg7[%c0_15, %c0_16] : memref<1x128xf32, #tpu.memory_space<vmem>>, vector<1x128xf32>
    %18 = vector.broadcast %17 : vector<1x128xf32> to vector<8x128xf32>
    %19 = arith.addf %16, %18 : vector<8x128xf32>
    %c0_17 = arith.constant 0 : index
    %c0_18 = arith.constant 0 : index
    %20 = vector.load %arg8[%c0_17, %c0_18] : memref<1x128xf32, #tpu.memory_space<vmem>>, vector<1x128xf32>
    %21 = vector.broadcast %20 : vector<1x128xf32> to vector<8x128xf32>
    %22 = arith.maximumf %19, %21 : vector<8x128xf32>
    %c0_19 = arith.constant 0 : index
    %c0_20 = arith.constant 0 : index
    %23 = vector.load %arg9[%c0_19, %c0_20] : memref<1x128xf32, #tpu.memory_space<vmem>>, vector<1x128xf32>
    %24 = vector.broadcast %23 : vector<1x128xf32> to vector<8x128xf32>
    %25 = arith.minimumf %22, %24 : vector<8x128xf32>
    %c0_21 = arith.constant 0 : index
    %c0_22 = arith.constant 0 : index
    %26 = vector.load %arg10[%c0_21, %c0_22] : memref<8x128xf32, #tpu.memory_space<vmem>>, vector<8x128xf32>
    tpu.vector_store %arg10[%c0_21, %c0_22], %25 {strides = array<i32>} : memref<8x128xf32, #tpu.memory_space<vmem>>, vector<8x128xf32>,
    return
  }
  func.func @transform_0(%arg0: i32) -> (i32, i32) {
    %c0_i32 = arith.constant 0 : i32
    %c0_i32_0 = arith.constant 0 : i32
    return %arg0, %c0_i32 : i32, i32
  }
  func.func @transform_1(%arg0: i32) -> (i32, i32) {
    %c0_i32 = arith.constant 0 : i32
    %c0_i32_0 = arith.constant 0 : i32
    %c0_i32_1 = arith.constant 0 : i32
    return %c0_i32, %c0_i32_0 : i32, i32
  }
  func.func @transform_2(%arg0: i32) -> (i32, i32) {
    %c0_i32 = arith.constant 0 : i32
    %c0_i32_0 = arith.constant 0 : i32
    %c0_i32_1 = arith.constant 0 : i32
    return %c0_i32, %c0_i32_0 : i32, i32
  }
  func.func @transform_3(%arg0: i32) -> (i32, i32) {
    %c0_i32 = arith.constant 0 : i32
    %c0_i32_0 = arith.constant 0 : i32
    %c0_i32_1 = arith.constant 0 : i32
    return %c0_i32, %c0_i32_0 : i32, i32
  }
  func.func @transform_4(%arg0: i32) -> (i32, i32) {
    %c0_i32 = arith.constant 0 : i32
    %c0_i32_0 = arith.constant 0 : i32
    %c0_i32_1 = arith.constant 0 : i32
    return %c0_i32, %c0_i32_0 : i32, i32
  }
  func.func @transform_5(%arg0: i32) -> (i32, i32) {
    %c0_i32 = arith.constant 0 : i32
    %c0_i32_0 = arith.constant 0 : i32
    %c0_i32_1 = arith.constant 0 : i32
    return %c0_i32, %c0_i32_0 : i32, i32
  }
  func.func @transform_6(%arg0: i32) -> (i32, i32) {
    %c0_i32 = arith.constant 0 : i32
    %c0_i32_0 = arith.constant 0 : i32
    %c0_i32_1 = arith.constant 0 : i32
    return %c0_i32, %c0_i32_0 : i32, i32
  }
  func.func @transform_7(%arg0: i32) -> (i32, i32) {
    %c0_i32 = arith.constant 0 : i32
    %c0_i32_0 = arith.constant 0 : i32
    %c0_i32_1 = arith.constant 0 : i32
    return %c0_i32, %c0_i32_0 : i32, i32
  }
  func.func @transform_8(%arg0: i32) -> (i32, i32) {
    %c0_i32 = arith.constant 0 : i32
    %c0_i32_0 = arith.constant 0 : i32
    %c0_i32_1 = arith.constant 0 : i32
    return %c0_i32, %c0_i32_0 : i32, i32
  }
  func.func @transform_9(%arg0: i32) -> (i32, i32) {
    %c0_i32 = arith.constant 0 : i32
    %c0_i32_0 = arith.constant 0 : i32
    return %arg0, %c0_i32 : i32, i32
  }
}

module attributes {stable_mosaic.version = 11 : i64} {
  func.func @actor_kernel(%arg0: i32, %arg1: memref<8x8xf32, #tpu.memory_space<vmem>>, %arg2: memref<8x32xf32, #tpu.memory_space<vmem>>, %arg3: memref<1x32xf32, #tpu.memory_space<vmem>>, %arg4: memref<32x32xf32, #tpu.memory_space<vmem>>, %arg5: memref<1x32xf32, #tpu.memory_space<vmem>>, %arg6: memref<32x128xf32, #tpu.memory_space<vmem>>, %arg7: memref<1x128xf32, #tpu.memory_space<vmem>>, %arg8: memref<1x128xf32, #tpu.memory_space<vmem>>, %arg9: memref<1x128xf32, #tpu.memory_space<vmem>>, %arg10: memref<8x128xf32, #tpu.memory_space<vmem>>) attributes {dimension_semantics = [#tpu.dimension_semantics<parallel>], iteration_bounds = array<i64: 1>, scalar_prefetch = 0 : i64, scratch_operands = 0 : i64, tpu.core_type = #tpu.core_type<tc>, window_params = [{transform_indices = @transform_0, window_bounds = array<i64: 8, 8>}, {pipeline_mode = #tpu.pipeline_mode<synchronous>, transform_indices = @transform_1, window_bounds = array<i64: 8, 32>}, {pipeline_mode = #tpu.pipeline_mode<synchronous>, transform_indices = @transform_2, window_bounds = array<i64: 1, 32>}, {pipeline_mode = #tpu.pipeline_mode<synchronous>, transform_indices = @transform_3, window_bounds = array<i64: 32, 32>}, {pipeline_mode = #tpu.pipeline_mode<synchronous>, transform_indices = @transform_4, window_bounds = array<i64: 1, 32>}, {pipeline_mode = #tpu.pipeline_mode<synchronous>, transform_indices = @transform_5, window_bounds = array<i64: 32, 128>}, {pipeline_mode = #tpu.pipeline_mode<synchronous>, transform_indices = @transform_6, window_bounds = array<i64: 1, 128>}, {pipeline_mode = #tpu.pipeline_mode<synchronous>, transform_indices = @transform_7, window_bounds = array<i64: 1, 128>}, {pipeline_mode = #tpu.pipeline_mode<synchronous>, transform_indices = @transform_8, window_bounds = array<i64: 1, 128>}, {transform_indices = @transform_9, window_bounds = array<i64: 8, 128>}]} {
    %c0 = arith.constant 0 : index
    %c0_0 = arith.constant 0 : index
    %0 = vector.load %arg1[%c0, %c0_0] : memref<8x8xf32, #tpu.memory_space<vmem>>, vector<8x8xf32>
    %c0_1 = arith.constant 0 : index
    %c0_2 = arith.constant 0 : index
    %1 = vector.load %arg2[%c0_1, %c0_2] : memref<8x32xf32, #tpu.memory_space<vmem>>, vector<8x32xf32>
    %cst = arith.constant dense<0.000000e+00> : vector<8x32xf32>
    %2 = tpu.matmul %0, %1, %cst {dimension_numbers = #tpu.dot_dimension_numbers<[1], [0], [0], [1], [0, 0, 1, 1], [], []>} : vector<8x8xf32>, vector<8x32xf32>, vector<8x32xf32> -> vector<8x32xf32>
    %c0_3 = arith.constant 0 : index
    %c0_4 = arith.constant 0 : index
    %3 = vector.load %arg3[%c0_3, %c0_4] : memref<1x32xf32, #tpu.memory_space<vmem>>, vector<1x32xf32>
    %4 = vector.broadcast %3 : vector<1x32xf32> to vector<8x32xf32>
    %5 = arith.addf %2, %4 : vector<8x32xf32>
    %cst_5 = arith.constant 0.000000e+00 : f32
    %6 = vector.broadcast %cst_5 : f32 to vector<8x32xf32>
    %7 = arith.maximumf %5, %6 : vector<8x32xf32>
    %c0_6 = arith.constant 0 : index
    %c0_7 = arith.constant 0 : index
    %8 = vector.load %arg4[%c0_6, %c0_7] : memref<32x32xf32, #tpu.memory_space<vmem>>, vector<32x32xf32>
    %cst_8 = arith.constant dense<0.000000e+00> : vector<8x32xf32>
    %9 = tpu.matmul %7, %8, %cst_8 {dimension_numbers = #tpu.dot_dimension_numbers<[1], [0], [0], [1], [0, 0, 1, 1], [], []>} : vector<8x32xf32>, vector<32x32xf32>, vector<8x32xf32> -> vector<8x32xf32>
    %c0_9 = arith.constant 0 : index
    %c0_10 = arith.constant 0 : index
    %10 = vector.load %arg5[%c0_9, %c0_10] : memref<1x32xf32, #tpu.memory_space<vmem>>, vector<1x32xf32>
    %11 = vector.broadcast %10 : vector<1x32xf32> to vector<8x32xf32>
    %12 = arith.addf %9, %11 : vector<8x32xf32>
    %cst_11 = arith.constant 0.000000e+00 : f32
    %13 = vector.broadcast %cst_11 : f32 to vector<8x32xf32>
    %14 = arith.maximumf %12, %13 : vector<8x32xf32>
    %c0_12 = arith.constant 0 : index
    %c0_13 = arith.constant 0 : index
    %15 = vector.load %arg6[%c0_12, %c0_13] : memref<32x128xf32, #tpu.memory_space<vmem>>, vector<32x128xf32>
    %cst_14 = arith.constant dense<0.000000e+00> : vector<8x128xf32>
    %16 = tpu.matmul %14, %15, %cst_14 {dimension_numbers = #tpu.dot_dimension_numbers<[1], [0], [0], [1], [0, 0, 1, 1], [], []>} : vector<8x32xf32>, vector<32x128xf32>, vector<8x128xf32> -> vector<8x128xf32>
    %c0_15 = arith.constant 0 : index
    %c0_16 = arith.constant 0 : index
    %17 = vector.load %arg7[%c0_15, %c0_16] : memref<1x128xf32, #tpu.memory_space<vmem>>, vector<1x128xf32>
    %18 = vector.broadcast %17 : vector<1x128xf32> to vector<8x128xf32>
    %19 = arith.addf %16, %18 : vector<8x128xf32>
    %c0_17 = arith.constant 0 : index
    %c0_18 = arith.constant 0 : index
    %20 = vector.load %arg8[%c0_17, %c0_18] : memref<1x128xf32, #tpu.memory_space<vmem>>, vector<1x128xf32>
    %21 = vector.broadcast %20 : vector<1x128xf32> to vector<8x128xf32>
    %22 = arith.maximumf %19, %21 : vector<8x128xf32>
    %c0_19 = arith.constant 0 : index
    %c0_20 = arith.constant 0 : index
    %23 = vector.load %arg9[%c0_19, %c0_20] : memref<1x128xf32, #tpu.memory_space<vmem>>, vector<1x128xf32>
    %24 = vector.broadcast %23 : vector<1x128xf32> to vector<8x128xf32>
    %25 = arith.minimumf %22, %24 : vector<8x128xf32>
    %c0_21 = arith.constant 0 : index
    %c0_22 = arith.constant 0 : index
    %26 = vector.load %arg10[%c0_21, %c0_22] : memref<8x128xf32, #tpu.memory_space<vmem>>, vector<8x128xf32>
    tpu.vector_store %arg10[%c0_21, %c0_22], %25 {strides = array<i32>} : memref<8x128xf32, #tpu.memory_space<vmem>>, vector<8x128xf32>,
    return
  }
  func.func @transform_0(%arg0: i32) -> (i32, i32) {
    %c0_i32 = arith.constant 0 : i32
    %c0_i32_0 = arith.constant 0 : i32
    return %arg0, %c0_i32 : i32, i32
  }
  func.func @transform_1(%arg0: i32) -> (i32, i32) {
    %c0_i32 = arith.constant 0 : i32
    %c0_i32_0 = arith.constant 0 : i32
    %c0_i32_1 = arith.constant 0 : i32
    return %c0_i32, %c0_i32_0 : i32, i32
  }
  func.func @transform_2(%arg0: i32) -> (i32, i32) {
    %c0_i32 = arith.constant 0 : i32
    %c0_i32_0 = arith.constant 0 : i32
    %c0_i32_1 = arith.constant 0 : i32
    return %c0_i32, %c0_i32_0 : i32, i32
  }
  func.func @transform_3(%arg0: i32) -> (i32, i32) {
    %c0_i32 = arith.constant 0 : i32
    %c0_i32_0 = arith.constant 0 : i32
    %c0_i32_1 = arith.constant 0 : i32
    return %c0_i32, %c0_i32_0 : i32, i32
  }
  func.func @transform_4(%arg0: i32) -> (i32, i32) {
    %c0_i32 = arith.constant 0 : i32
    %c0_i32_0 = arith.constant 0 : i32
    %c0_i32_1 = arith.constant 0 : i32
    return %c0_i32, %c0_i32_0 : i32, i32
  }
  func.func @transform_5(%arg0: i32) -> (i32, i32) {
    %c0_i32 = arith.constant 0 : i32
    %c0_i32_0 = arith.constant 0 : i32
    %c0_i32_1 = arith.constant 0 : i32
    return %c0_i32, %c0_i32_0 : i32, i32
  }
  func.func @transform_6(%arg0: i32) -> (i32, i32) {
    %c0_i32 = arith.constant 0 : i32
    %c0_i32_0 = arith.constant 0 : i32
    %c0_i32_1 = arith.constant 0 : i32
    return %c0_i32, %c0_i32_0 : i32, i32
  }
  func.func @transform_7(%arg0: i32) -> (i32, i32) {
    %c0_i32 = arith.constant 0 : i32
    %c0_i32_0 = arith.constant 0 : i32
    %c0_i32_1 = arith.constant 0 : i32
    return %c0_i32, %c0_i32_0 : i32, i32
  }
  func.func @transform_8(%arg0: i32) -> (i32, i32) {
    %c0_i32 = arith.constant 0 : i32
    %c0_i32_0 = arith.constant 0 : i32
    %c0_i32_1 = arith.constant 0 : i32
    return %c0_i32, %c0_i32_0 : i32, i32
  }
  func.func @transform_9(%arg0: i32) -> (i32, i32) {
    %c0_i32 = arith.constant 0 : i32
    %c0_i32_0 = arith.constant 0 : i32
    return %arg0, %c0_i32 : i32, i32
  }
}

</mosaic_0001>

<bundles_post_ra>
// kernel: tpu_custom_call.1
= control target key start
LH: loop header
LB: loop body
LE: loop exit
PB: predicated region body
PF: predicated region fallthrough
CT: control target
= control target key end

     0   :  { %14 = vsyncpa [#allocation3], 0  ;;  %s694_s0 = inlined_call_operand.hbm [shape: f32[8,8], index: 0, kind: input, shape index: {}]   ;;  %s695_s1 = inlined_call_operand.hbm [shape: f32[8,32], index: 1, kind: input, shape index: {}]   ;;  %s696_s2 = inlined_call_operand.vmem [shape: f32[1,32], index: 2, kind: input, shape index: {}]   ;;  %s697_s3 = inlined_call_operand.hbm [shape: f32[32,32], index: 3, kind: input, shape index: {}]   ;;  %s698_s4 = inlined_call_operand.vmem [shape: f32[1,32], index: 4, kind: input, shape index: {}]   ;;  %s699_s5 = inlined_call_operand.hbm [shape: f32[32,128], index: 5, kind: input, shape index: {}]   ;;  %s700_s6 = inlined_call_operand.vmem [shape: f32[1,128], index: 6, kind: input, shape index: {}]   ;;  %s701_s7 = inlined_call_operand.vmem [shape: f32[1,128], index: 7, kind: input, shape index: {}]   ;;  %s702_s8 = inlined_call_operand.vmem [shape: f32[1,128], index: 8, kind: input, shape index: {}]   ;;  %s703_s9 = inlined_call_operand.hbm [shape: f32[8,128], index: 9, kind: output, shape index: {}]  }
   0x1   :  { %15 = vsyncpa [#allocation6], 0 }
   0x2   :  { %16 = vsyncpa [#allocation9], 0 }
   0x3   :  { %17 = vsyncpa [#allocation4], 0  ;;  %s559_s30 = smov [#allocation5]   ;;  %s560_s11 = smov [#allocation2]  }
   0x4   :  { %s34_s10 = sshll.u32 %s559_s30, 4  ;;  %s24_s12 = sshll.u32 %s560_s11, 4  ;;  %s35_s10 = int_to_ptr.vmem [resolvable:$true] %s34_s10  ;;  %s25_s12 = int_to_ptr.vmem [resolvable:$true] %s24_s12 }
   0x5   :  { %s441_s15 = scalar_lea.hbm %s695_s1, 128 }
   0x6   :  { %p442_p0 = scmp.ne.s32.totalorder %s695_s1, %s441_s15  ;;  %p445_p1 = scmp.lt.u32.totalorder %s441_s15, %s695_s1 }
   0x8   :  { %p447_p2 = pnand %p445_p1, %p442_p0 }
   0xa   :  { %450 = shalt.err (!%p447_p2)
}
   0xb   :  { %s451_s20 = scalar_lea.vmem %s35_s10, 128  ;;  %p456_p4 = scmp.lt.s32.totalorder %s35_s10, %s35_s10 }
   0xc   :  { %p452_p3 = scmp.ne.s32.totalorder %s35_s10, %s451_s20  ;;  %p457_p5 = scmp.lt.s32.totalorder %s451_s20, %s451_s20 }
   0xe   :  { %p458_p6 = por %p457_p5, %p456_p4 }
  0x10   :  { %p459_p7 = pnand %p458_p6, %p452_p3 }
  0x12   :  { %462 = shalt.err (!%p459_p7)
}
  0x13   :  { %37 = dma.hbm_to_vmem [thread:$0]  %s695_s1, 128, %s35_s10, [#allocation6]  }
  0x14   :  { %s463_s25 = scalar_lea.hbm %s694_s0, 128 }
  0x15   :  { %p464_p8 = scmp.ne.s32.totalorder %s694_s0, %s463_s25  ;;  %p467_p9 = scmp.lt.u32.totalorder %s463_s25, %s694_s0 }
  0x17   :  { %p469_p10 = pnand %p467_p9, %p464_p8 }
  0x19   :  { %472 = shalt.err (!%p469_p10)
}
  0x1a   :  { %s473_s30 = scalar_lea.vmem %s25_s12, 128  ;;  %p478_p12 = scmp.lt.s32.totalorder %s25_s12, %s25_s12 }
  0x1b   :  { %p474_p11 = scmp.ne.s32.totalorder %s25_s12, %s473_s30  ;;  %p479_p13 = scmp.lt.s32.totalorder %s473_s30, %s473_s30 }
  0x1d   :  { %p480_p0 = por %p479_p13, %p478_p12 }
  0x1f   :  { %p481_p1 = pnand %p480_p0, %p474_p11 }
  0x21   :  { %484 = shalt.err (!%p481_p1)
}
  0x22   :  { %27 = dma.hbm_to_vmem [thread:$0]  %s694_s0, 128, %s25_s12, [#allocation3]  }
  0x23   :  { %s561_s11 = smov [#allocation7]   ;;  %s485_s16 = scalar_lea.hbm %s697_s3, 512 }
  0x24   :  { %s45_s13 = sshll.u32 %s561_s11, 4  ;;  %p486_p2 = scmp.ne.s32.totalorder %s697_s3, %s485_s16  ;;  %s46_s13 = int_to_ptr.vmem [resolvable:$true] %s45_s13 }
  0x25   :  { %p489_p3 = scmp.lt.u32.totalorder %s485_s16, %s697_s3 }
  0x27   :  { %p491_p4 = pnand %p489_p3, %p486_p2 }
  0x29   :  { %494 = shalt.err (!%p491_p4)
}
  0x2a   :  { %s495_s21 = scalar_lea.vmem %s46_s13, 512  ;;  %p500_p6 = scmp.lt.s32.totalorder %s46_s13, %s46_s13 }
  0x2b   :  { %p496_p5 = scmp.ne.s32.totalorder %s46_s13, %s495_s21  ;;  %p501_p7 = scmp.lt.s32.totalorder %s495_s21, %s495_s21 }
  0x2d   :  { %p502_p8 = por %p501_p7, %p500_p6 }
  0x2f   :  { %p503_p9 = pnand %p502_p8, %p496_p5 }
  0x31   :  { %506 = shalt.err (!%p503_p9)
}
  0x32   :  { %s562_s0 = smov 128   ;;  %s563_s12 = smov 8  }
  0x33   :  { %51 = dma.hbm_to_vmem [thread:$0]  %s697_s3, 512, %s46_s13, [#allocation6], %s562_s0, %s562_s0, %s563_s12  }
  0x34   :  { %s564_s24 = smov [#allocation8]   ;;  %s507_s28 = scalar_lea.hbm %s699_s5, 512 }
  0x35   :  { %s59_s25 = sshll.u32 %s564_s24, 4  ;;  %p508_p10 = scmp.ne.s32.totalorder %s699_s5, %s507_s28  ;;  %s60_s25 = int_to_ptr.vmem [resolvable:$true] %s59_s25 }
  0x36   :  { %p511_p11 = scmp.lt.u32.totalorder %s507_s28, %s699_s5 }
  0x38   :  { %p513_p12 = pnand %p511_p11, %p508_p10 }
  0x3a   :  { %516 = shalt.err (!%p513_p12)
}
  0x3b   :  { %s517_s11 = scalar_lea.vmem %s60_s25, 512  ;;  %p522_p0 = scmp.lt.s32.totalorder %s60_s25, %s60_s25 }
  0x3c   :  { %p518_p13 = scmp.ne.s32.totalorder %s60_s25, %s517_s11  ;;  %p523_p1 = scmp.lt.s32.totalorder %s517_s11, %s517_s11 }
  0x3e   :  { %p524_p2 = por %p523_p1, %p522_p0 }
  0x40   :  { %p525_p3 = pnand %p524_p2, %p518_p13 }
  0x42   :  { %528 = shalt.err (!%p525_p3)
}
  0x43   :  { %65 = dma.hbm_to_vmem [thread:$0]  %s699_s5, 512, %s60_s25, [#allocation9], %s562_s0, %s562_s0, %s563_s12  }
  0x44   :  { %551 = dma.done.wait [#allocation3], 128  }
  0x45   :  { %552 = vsyncadd [#allocation3], 4294967168 }
  0x46   :  { %553 = dma.done.wait [#allocation6], 640  }
  0x47   :  { %554 = vsyncadd [#allocation6], 4294966656 }
  0x48   :  { %555 = dma.done.wait [#allocation9], 512  }
  0x49   :  { %556 = vsyncadd [#allocation9], 4294966784  ;;  %v565_v0 = vmov 0.0   ;;  %vm566_vm0 = vmmov 0   ;;  %v567_v1 = vmov 0.0|0.0   ;;  %vm93_vm1 = vcmask 64512  }
  0x4a   :  { %392 = vmatprep.subr.mxu0 %v565_v0  ;;  %394 = vmatprep.mubr.msk.f32.mxu0 %vm566_vm0, %v565_v0  ;;  %v85_v2 = vld [vmem:[#allocation5] sm:$0xff]  ;;  %v84_v3 = vld [vmem:[#allocation2] sm:$0xff]  ;;  %v168_v4 = vld [vmem:[#allocation7] sm:$0xff]  ;;  %vm179_vm2 = vcmask 261120  }
  0x4b   :  { %419 = vmatprep.subr.bf16.mxu1 %v567_v1  ;;  %405 = vmatprep.mubr.msk.f32.mxu1 %vm566_vm0, %v565_v0  ;;  %v169_v5 = vld [vmem:[#allocation7 + $0x8] sm:$0xff]  ;;  %v170_v7 = vld [vmem:[#allocation7 + $0x10] sm:$0xff]  ;;  %v171_v8 = vld [vmem:[#allocation7 + $0x18] sm:$0xff] }
  0x4c   :  { %393 = vmatpush3.msra.mxu0 %v85_v2  ;;  %v420_v6 = vpack.c.bf16 %v169_v5, %v168_v4  ;;  %v423_v9 = vpack.c.bf16 %v171_v8, %v170_v7  ;;  %v254_v10 = vld [vmem:[#allocation8] sm:$0xff]  ;;  %v255_v11 = vld [vmem:[#allocation8 + $0x8] sm:$0xff]  ;;  %v372_v13 = vld [vmem:[%s696_s2] ss:$0 sm:$0xff] }
  0x4d   :  { %395 = vmatmul.mubr.msk.f32.vlgmr.msra.gmra.mrb[0].mxu0 %vm93_vm1, %v84_v3  ;;  %425 = vmatprep.subr.bf16.mxu0 %v567_v1  ;;  %v426_v12 = vpack.c.bf16 %v255_v11, %v254_v10  ;;  %v256_v18 = vld [vmem:[#allocation8 + $0x10] sm:$0xff]  ;;  %v257_v19 = vld [vmem:[#allocation8 + $0x18] sm:$0xff] }
  0x4e   :  { %416 = vmatprep.mubr.msk.f32.mxu0 %vm566_vm0, %v565_v0  ;;  %421 = vmatpush3.bf16.msra.mxu1 %v420_v6  ;;  %v429_v20 = vpack.c.bf16 %v257_v19, %v256_v18  ;;  %v374_v21 = vld [vmem:[%s698_s4] ss:$0 sm:$0xff]  ;;  %s568_s4 = smov [#allocation10]  }
  0x4f   :  { %422 = vmatprep.subr.bf16.mxu1 %v567_v1  ;;  %427 = vmatpush3.bf16.msra.mxu0 %v426_v12  ;;  %v376_v26 = vld [vmem:[%s700_s6] ss:$0 sm:$0xff]  ;;  %s361_s0 = sshll.u32 %s568_s4, 4  ;;  %s362_s0 = int_to_ptr.vmem [resolvable:$true] %s361_s0 }
  0x50   :  { %428 = vmatprep.subr.bf16.mxu0 %v567_v1  ;;  %v378_v28 = vld [vmem:[%s701_s7] ss:$0 sm:$0xff]  ;;  %s529_s12 = scalar_lea.vmem %s362_s0, 128  ;;  %p534_p5 = scmp.lt.s32.totalorder %s362_s0, %s362_s0 }
  0x51   :  { %v379_v31 = vld [vmem:[%s702_s8] ss:$0 sm:$0xff]  ;;  %p530_p4 = scmp.ne.s32.totalorder %s362_s0, %s529_s12  ;;  %p535_p6 = scmp.lt.s32.totalorder %s529_s12, %s529_s12 }
  0x52   :  { %424 = vmatpush3.bf16.msra.mxu1 %v423_v9 }
  0x53   :  { %430 = vmatpush3.bf16.msra.mxu0 %v429_v20  ;;  %p536_p7 = por %p535_p6, %p534_p5 }
  0x55   :  { %p537_p8 = pnand %p536_p7, %p530_p4 }
 0x120   :  { %v163_v14 = vpop.f32.mrb[0].mxu0 }
 0x121   :  { %v164_v15 = vadd.f32 %v372_v13, %v163_v14  ;;  %v396_v16 = vpop.f32.mrb[1].mxu0 }
 0x123   :  { %v167_v17 = vmax.f32 %v164_v15, 0.0 }
 0x125   :  { %406 = vmatmul.mubr.msk.f32.vlgmr.msra.gmra.mrb[0].mxu1 %vm179_vm2, %v167_v17 }
 0x1f8   :  { %v249_v22 = vpop.f32.mrb[0].mxu1 }
 0x1f9   :  { %v250_v23 = vadd.f32 %v374_v21, %v249_v22  ;;  %v407_v24 = vpop.f32.mrb[1].mxu1 }
 0x1fb   :  { %v253_v25 = vmax.f32 %v250_v23, 0.0 }
 0x1fd   :  { %417 = vmatmul.mubr.msk.f32.vlgmr.msra.gmra.mrb[2].mxu0 %vm179_vm2, %v253_v25 }
 0x2d0   :  { %v334_v27 = vpop.f32.mrb[2].mxu0 }
 0x2d1   :  { %v335_v29 = vadd.f32 %v376_v26, %v334_v27  ;;  %v418_v30 = vpop.f32.mrb[3].mxu0 }
 0x2d3   :  { %v345_v32 = vmax.f32 %v335_v29, %v378_v28 }
 0x2d5   :  { %v353_v33 = vmin.f32 %v345_v32, %v379_v31 }
 0x2d7   :  { %354 = vst [vmem:[#allocation10] sm:$0xff] %v353_v33 }
 0x2d8   :  { %540 = shalt.err (!%p537_p8)
}
 0x2d9   :  { %s541_s22 = scalar_lea.hbm %s703_s9, 128 }
 0x2da   :  { %p542_p9 = scmp.ne.s32.totalorder %s703_s9, %s541_s22  ;;  %p545_p10 = scmp.lt.u32.totalorder %s541_s22, %s703_s9 }
 0x2dc   :  { %p547_p11 = pnand %p545_p10, %p542_p9 }
 0x2de   :  { %550 = shalt.err (!%p547_p11)
}
 0x2df   :  { %364 = dma.vmem_to_hbm [thread:$0]  %s362_s0, 128, %s703_s9, [#allocation4]  }
 0x2e0   :  { %557 = dma.done.wait [#allocation4], 128  }
 0x2e1   :  { %558 = vsyncadd [#allocation4], 4294967168 }
 0x2e2   :  { %368 = vsyncpa [#allocation3], 1 }
 0x2e3   :  { %369 = vsyncpa [#allocation6], 1 }
 0x2e4   :  { %370 = vsyncpa [#allocation9], 1 }
 0x2e5   :  { %371 = vsyncpa [#allocation4], 1 }

// kernel: tpu_custom_call.1
= control target key start
LH: loop header
LB: loop body
LE: loop exit
PB: predicated region body
PF: predicated region fallthrough
CT: control target
= control target key end

     0   :  { %14 = vsyncpa [#allocation3], 0  ;;  %s694_s0 = inlined_call_operand.hbm [shape: f32[8,8], index: 0, kind: input, shape index: {}]   ;;  %s695_s1 = inlined_call_operand.hbm [shape: f32[8,32], index: 1, kind: input, shape index: {}]   ;;  %s696_s2 = inlined_call_operand.vmem [shape: f32[1,32], index: 2, kind: input, shape index: {}]   ;;  %s697_s3 = inlined_call_operand.hbm [shape: f32[32,32], index: 3, kind: input, shape index: {}]   ;;  %s698_s4 = inlined_call_operand.vmem [shape: f32[1,32], index: 4, kind: input, shape index: {}]   ;;  %s699_s5 = inlined_call_operand.hbm [shape: f32[32,128], index: 5, kind: input, shape index: {}]   ;;  %s700_s6 = inlined_call_operand.vmem [shape: f32[1,128], index: 6, kind: input, shape index: {}]   ;;  %s701_s7 = inlined_call_operand.vmem [shape: f32[1,128], index: 7, kind: input, shape index: {}]   ;;  %s702_s8 = inlined_call_operand.vmem [shape: f32[1,128], index: 8, kind: input, shape index: {}]   ;;  %s703_s9 = inlined_call_operand.hbm [shape: f32[8,128], index: 9, kind: output, shape index: {}]  }
   0x1   :  { %15 = vsyncpa [#allocation6], 0 }
   0x2   :  { %16 = vsyncpa [#allocation9], 0 }
   0x3   :  { %17 = vsyncpa [#allocation4], 0  ;;  %s559_s30 = smov [#allocation5]   ;;  %s560_s11 = smov [#allocation2]  }
   0x4   :  { %s34_s10 = sshll.u32 %s559_s30, 4  ;;  %s24_s12 = sshll.u32 %s560_s11, 4  ;;  %s35_s10 = int_to_ptr.vmem [resolvable:$true] %s34_s10  ;;  %s25_s12 = int_to_ptr.vmem [resolvable:$true] %s24_s12 }
   0x5   :  { %s441_s15 = scalar_lea.hbm %s695_s1, 128 }
   0x6   :  { %p442_p0 = scmp.ne.s32.totalorder %s695_s1, %s441_s15  ;;  %p445_p1 = scmp.lt.u32.totalorder %s441_s15, %s695_s1 }
   0x8   :  { %p447_p2 = pnand %p445_p1, %p442_p0 }
   0xa   :  { %450 = shalt.err (!%p447_p2)
}
   0xb   :  { %s451_s20 = scalar_lea.vmem %s35_s10, 128  ;;  %p456_p4 = scmp.lt.s32.totalorder %s35_s10, %s35_s10 }
   0xc   :  { %p452_p3 = scmp.ne.s32.totalorder %s35_s10, %s451_s20  ;;  %p457_p5 = scmp.lt.s32.totalorder %s451_s20, %s451_s20 }
   0xe   :  { %p458_p6 = por %p457_p5, %p456_p4 }
  0x10   :  { %p459_p7 = pnand %p458_p6, %p452_p3 }
  0x12   :  { %462 = shalt.err (!%p459_p7)
}
  0x13   :  { %37 = dma.hbm_to_vmem [thread:$0]  %s695_s1, 128, %s35_s10, [#allocation6]  }
  0x14   :  { %s463_s25 = scalar_lea.hbm %s694_s0, 128 }
  0x15   :  { %p464_p8 = scmp.ne.s32.totalorder %s694_s0, %s463_s25  ;;  %p467_p9 = scmp.lt.u32.totalorder %s463_s25, %s694_s0 }
  0x17   :  { %p469_p10 = pnand %p467_p9, %p464_p8 }
  0x19   :  { %472 = shalt.err (!%p469_p10)
}
  0x1a   :  { %s473_s30 = scalar_lea.vmem %s25_s12, 128  ;;  %p478_p12 = scmp.lt.s32.totalorder %s25_s12, %s25_s12 }
  0x1b   :  { %p474_p11 = scmp.ne.s32.totalorder %s25_s12, %s473_s30  ;;  %p479_p13 = scmp.lt.s32.totalorder %s473_s30, %s473_s30 }
  0x1d   :  { %p480_p0 = por %p479_p13, %p478_p12 }
  0x1f   :  { %p481_p1 = pnand %p480_p0, %p474_p11 }
  0x21   :  { %484 = shalt.err (!%p481_p1)
}
  0x22   :  { %27 = dma.hbm_to_vmem [thread:$0]  %s694_s0, 128, %s25_s12, [#allocation3]  }
  0x23   :  { %s561_s11 = smov [#allocation7]   ;;  %s485_s16 = scalar_lea.hbm %s697_s3, 512 }
  0x24   :  { %s45_s13 = sshll.u32 %s561_s11, 4  ;;  %p486_p2 = scmp.ne.s32.totalorder %s697_s3, %s485_s16  ;;  %s46_s13 = int_to_ptr.vmem [resolvable:$true] %s45_s13 }
  0x25   :  { %p489_p3 = scmp.lt.u32.totalorder %s485_s16, %s697_s3 }
  0x27   :  { %p491_p4 = pnand %p489_p3, %p486_p2 }
  0x29   :  { %494 = shalt.err (!%p491_p4)
}
  0x2a   :  { %s495_s21 = scalar_lea.vmem %s46_s13, 512  ;;  %p500_p6 = scmp.lt.s32.totalorder %s46_s13, %s46_s13 }
  0x2b   :  { %p496_p5 = scmp.ne.s32.totalorder %s46_s13, %s495_s21  ;;  %p501_p7 = scmp.lt.s32.totalorder %s495_s21, %s495_s21 }
  0x2d   :  { %p502_p8 = por %p501_p7, %p500_p6 }
  0x2f   :  { %p503_p9 = pnand %p502_p8, %p496_p5 }
  0x31   :  { %506 = shalt.err (!%p503_p9)
}
  0x32   :  { %s562_s0 = smov 128   ;;  %s563_s12 = smov 8  }
  0x33   :  { %51 = dma.hbm_to_vmem [thread:$0]  %s697_s3, 512, %s46_s13, [#allocation6], %s562_s0, %s562_s0, %s563_s12  }
  0x34   :  { %s564_s24 = smov [#allocation8]   ;;  %s507_s28 = scalar_lea.hbm %s699_s5, 512 }
  0x35   :  { %s59_s25 = sshll.u32 %s564_s24, 4  ;;  %p508_p10 = scmp.ne.s32.totalorder %s699_s5, %s507_s28  ;;  %s60_s25 = int_to_ptr.vmem [resolvable:$true] %s59_s25 }
  0x36   :  { %p511_p11 = scmp.lt.u32.totalorder %s507_s28, %s699_s5 }
  0x38   :  { %p513_p12 = pnand %p511_p11, %p508_p10 }
  0x3a   :  { %516 = shalt.err (!%p513_p12)
}
  0x3b   :  { %s517_s11 = scalar_lea.vmem %s60_s25, 512  ;;  %p522_p0 = scmp.lt.s32.totalorder %s60_s25, %s60_s25 }
  0x3c   :  { %p518_p13 = scmp.ne.s32.totalorder %s60_s25, %s517_s11  ;;  %p523_p1 = scmp.lt.s32.totalorder %s517_s11, %s517_s11 }
  0x3e   :  { %p524_p2 = por %p523_p1, %p522_p0 }
  0x40   :  { %p525_p3 = pnand %p524_p2, %p518_p13 }
  0x42   :  { %528 = shalt.err (!%p525_p3)
}
  0x43   :  { %65 = dma.hbm_to_vmem [thread:$0]  %s699_s5, 512, %s60_s25, [#allocation9], %s562_s0, %s562_s0, %s563_s12  }
  0x44   :  { %551 = dma.done.wait [#allocation3], 128  }
  0x45   :  { %552 = vsyncadd [#allocation3], 4294967168 }
  0x46   :  { %553 = dma.done.wait [#allocation6], 640  }
  0x47   :  { %554 = vsyncadd [#allocation6], 4294966656 }
  0x48   :  { %555 = dma.done.wait [#allocation9], 512  }
  0x49   :  { %556 = vsyncadd [#allocation9], 4294966784  ;;  %v565_v0 = vmov 0.0   ;;  %vm566_vm0 = vmmov 0   ;;  %v567_v1 = vmov 0.0|0.0   ;;  %vm93_vm1 = vcmask 64512  }
  0x4a   :  { %392 = vmatprep.subr.mxu0 %v565_v0  ;;  %394 = vmatprep.mubr.msk.f32.mxu0 %vm566_vm0, %v565_v0  ;;  %v85_v2 = vld [vmem:[#allocation5] sm:$0xff]  ;;  %v84_v3 = vld [vmem:[#allocation2] sm:$0xff]  ;;  %v168_v4 = vld [vmem:[#allocation7] sm:$0xff]  ;;  %vm179_vm2 = vcmask 261120  }
  0x4b   :  { %419 = vmatprep.subr.bf16.mxu1 %v567_v1  ;;  %405 = vmatprep.mubr.msk.f32.mxu1 %vm566_vm0, %v565_v0  ;;  %v169_v5 = vld [vmem:[#allocation7 + $0x8] sm:$0xff]  ;;  %v170_v7 = vld [vmem:[#allocation7 + $0x10] sm:$0xff]  ;;  %v171_v8 = vld [vmem:[#allocation7 + $0x18] sm:$0xff] }
  0x4c   :  { %393 = vmatpush3.msra.mxu0 %v85_v2  ;;  %v420_v6 = vpack.c.bf16 %v169_v5, %v168_v4  ;;  %v423_v9 = vpack.c.bf16 %v171_v8, %v170_v7  ;;  %v254_v10 = vld [vmem:[#allocation8] sm:$0xff]  ;;  %v255_v11 = vld [vmem:[#allocation8 + $0x8] sm:$0xff]  ;;  %v372_v13 = vld [vmem:[%s696_s2] ss:$0 sm:$0xff] }
  0x4d   :  { %395 = vmatmul.mubr.msk.f32.vlgmr.msra.gmra.mrb[0].mxu0 %vm93_vm1, %v84_v3  ;;  %425 = vmatprep.subr.bf16.mxu0 %v567_v1  ;;  %v426_v12 = vpack.c.bf16 %v255_v11, %v254_v10  ;;  %v256_v18 = vld [vmem:[#allocation8 + $0x10] sm:$0xff]  ;;  %v257_v19 = vld [vmem:[#allocation8 + $0x18] sm:$0xff] }
  0x4e   :  { %416 = vmatprep.mubr.msk.f32.mxu0 %vm566_vm0, %v565_v0  ;;  %421 = vmatpush3.bf16.msra.mxu1 %v420_v6  ;;  %v429_v20 = vpack.c.bf16 %v257_v19, %v256_v18  ;;  %v374_v21 = vld [vmem:[%s698_s4] ss:$0 sm:$0xff]  ;;  %s568_s4 = smov [#allocation10]  }
  0x4f   :  { %422 = vmatprep.subr.bf16.mxu1 %v567_v1  ;;  %427 = vmatpush3.bf16.msra.mxu0 %v426_v12  ;;  %v376_v26 = vld [vmem:[%s700_s6] ss:$0 sm:$0xff]  ;;  %s361_s0 = sshll.u32 %s568_s4, 4  ;;  %s362_s0 = int_to_ptr.vmem [resolvable:$true] %s361_s0 }
  0x50   :  { %428 = vmatprep.subr.bf16.mxu0 %v567_v1  ;;  %v378_v28 = vld [vmem:[%s701_s7] ss:$0 sm:$0xff]  ;;  %s529_s12 = scalar_lea.vmem %s362_s0, 128  ;;  %p534_p5 = scmp.lt.s32.totalorder %s362_s0, %s362_s0 }
  0x51   :  { %v379_v31 = vld [vmem:[%s702_s8] ss:$0 sm:$0xff]  ;;  %p530_p4 = scmp.ne.s32.totalorder %s362_s0, %s529_s12  ;;  %p535_p6 = scmp.lt.s32.totalorder %s529_s12, %s529_s12 }
  0x52   :  { %424 = vmatpush3.bf16.msra.mxu1 %v423_v9 }
  0x53   :  { %430 = vmatpush3.bf16.msra.mxu0 %v429_v20  ;;  %p536_p7 = por %p535_p6, %p534_p5 }
  0x55   :  { %p537_p8 = pnand %p536_p7, %p530_p4 }
 0x120   :  { %v163_v14 = vpop.f32.mrb[0].mxu0 }
 0x121   :  { %v164_v15 = vadd.f32 %v372_v13, %v163_v14  ;;  %v396_v16 = vpop.f32.mrb[1].mxu0 }
 0x123   :  { %v167_v17 = vmax.f32 %v164_v15, 0.0 }
 0x125   :  { %406 = vmatmul.mubr.msk.f32.vlgmr.msra.gmra.mrb[0].mxu1 %vm179_vm2, %v167_v17 }
 0x1f8   :  { %v249_v22 = vpop.f32.mrb[0].mxu1 }
 0x1f9   :  { %v250_v23 = vadd.f32 %v374_v21, %v249_v22  ;;  %v407_v24 = vpop.f32.mrb[1].mxu1 }
 0x1fb   :  { %v253_v25 = vmax.f32 %v250_v23, 0.0 }
 0x1fd   :  { %417 = vmatmul.mubr.msk.f32.vlgmr.msra.gmra.mrb[2].mxu0 %vm179_vm2, %v253_v25 }
 0x2d0   :  { %v334_v27 = vpop.f32.mrb[2].mxu0 }
 0x2d1   :  { %v335_v29 = vadd.f32 %v376_v26, %v334_v27  ;;  %v418_v30 = vpop.f32.mrb[3].mxu0 }
 0x2d3   :  { %v345_v32 = vmax.f32 %v335_v29, %v378_v28 }
 0x2d5   :  { %v353_v33 = vmin.f32 %v345_v32, %v379_v31 }
 0x2d7   :  { %354 = vst [vmem:[#allocation10] sm:$0xff] %v353_v33 }
 0x2d8   :  { %540 = shalt.err (!%p537_p8)
}
 0x2d9   :  { %s541_s22 = scalar_lea.hbm %s703_s9, 128 }
 0x2da   :  { %p542_p9 = scmp.ne.s32.totalorder %s703_s9, %s541_s22  ;;  %p545_p10 = scmp.lt.u32.totalorder %s541_s22, %s703_s9 }
 0x2dc   :  { %p547_p11 = pnand %p545_p10, %p542_p9 }
 0x2de   :  { %550 = shalt.err (!%p547_p11)
}
 0x2df   :  { %364 = dma.vmem_to_hbm [thread:$0]  %s362_s0, 128, %s703_s9, [#allocation4]  }
 0x2e0   :  { %557 = dma.done.wait [#allocation4], 128  }
 0x2e1   :  { %558 = vsyncadd [#allocation4], 4294967168 }
 0x2e2   :  { %368 = vsyncpa [#allocation3], 1 }
 0x2e3   :  { %369 = vsyncpa [#allocation6], 1 }
 0x2e4   :  { %370 = vsyncpa [#allocation9], 1 }
 0x2e5   :  { %371 = vsyncpa [#allocation4], 1 }

</bundles_post_ra>
